<compile_context>
chip_gen: v7x
topology: tpu7x:2x2x1
jax: 0.10.0
libtpu: 0.0.40
codegen_flags: <defaults>
</compile_context>

<pallas_src>
import jax
import jax.numpy as jnp
import numpy as np
from jax.experimental import pallas as pl
from jax.experimental.pallas import tpu as pltpu


def rrrb_kernel(x_ref, we_ref, be_ref, wcat_ref, bc_ref, wr_ref, br_ref, o_ref):
    H = x_ref.shape[1]
    cdt = we_ref.dtype                                # matmul compute dtype
    x = x_ref[0]                                      # (H, W*Cin), f32

    # ---- expand_conv: 1x1 conv as one packed (block-diagonal) matmul -------
    out1 = jnp.dot(x.astype(cdt), we_ref[...],
                   preferred_element_type=jnp.float32) + be_ref[...]

    # ---- vertical 3x3 taps: sublane roll (XLU) + edge masks ----------------
    # Horizontal taps + the identity branch are folded into wcat; the
    # out-of-image (bias border) contributions live in bc_ref.
    row = jax.lax.broadcasted_iota(jnp.int32, out1.shape, 0)
    dn = jnp.where(row > 0, pltpu.roll(out1, shift=1, axis=0), 0.0)      # out1[r-1]
    up = jnp.where(row < H - 1, pltpu.roll(out1, shift=H - 1, axis=0), 0.0)  # out1[r+1]
    taps = jnp.concatenate([dn, out1, up], axis=1)    # (H, 3*W*Cout), lane-aligned

    # ---- fea_conv (3x3) + identity + border/bias constant: ONE matmul ------
    out2 = jnp.dot(taps.astype(cdt), wcat_ref[...],
                   preferred_element_type=jnp.float32) + bc_ref[...]

    # ---- reduce_conv: 1x1 conv + bias + outer residual ----------------------
    o_ref[0] = (jnp.dot(out2.astype(cdt), wr_ref[...],
                        preferred_element_type=jnp.float32)
                + br_ref[...] + x)


def rrrb_forward(x_nchw, params, matmul_dtype=jnp.float32):
    """Plain-JAX glue: lane-dense repacking + weight packing + pallas_call."""
    We_oihw, be, Wf_oihw, bf, Wr_oihw, br = params
    B, Cin, H, W = x_nchw.shape
    Cout = We_oihw.shape[0]
    f32 = jnp.float32
    WCin, WCout = W * Cin, W * Cout

    # ---- pack input: NCHW -> (B, H, W*Cin) ----------------------------------
    x_packed = jnp.transpose(x_nchw, (0, 2, 3, 1)).reshape(B, H, WCin).astype(f32)

    # ---- 1x1 convs as block-diagonal packed weights -------------------------
    We = jnp.transpose(We_oihw[:, :, 0, 0], (1, 0)).astype(f32)     # (Cin, Cout)
    Wr = jnp.transpose(Wr_oihw[:, :, 0, 0], (1, 0)).astype(f32)     # (Cout, Cin)
    eyeW = jnp.eye(W, dtype=f32)
    We_block = jnp.kron(eyeW, We)                                   # (W*Cin, W*Cout)
    Wr_block = jnp.kron(eyeW, Wr)                                   # (W*Cout, W*Cin)
    be_row = jnp.tile(be.astype(f32), W).reshape(1, WCout)
    br_row = jnp.tile(br.astype(f32), W).reshape(1, WCin)

    # ---- 3x3 conv: block-tridiagonal packed weight, identity folded in ------
    Wf_mat = jnp.transpose(Wf_oihw.astype(f32), (2, 3, 1, 0))       # (kh, kw, Cin, Cout)

    def band(kh):  # (W*Cout, W*Cout): horizontal taps for one vertical offset
        return sum(jnp.kron(jnp.eye(W, k=1 - kw, dtype=f32), Wf_mat[kh, kw])
                   for kw in range(3))

    Wcat = jnp.concatenate(
        [band(0), band(1) + jnp.eye(WCout, dtype=f32), band(2)],
        axis=0)                                                     # (3*W*Cout, W*Cout)

    # ---- analytic border contribution of fea_conv + fea bias ----------------
    # pad_tensor sets the whole 1-pixel border to the expand bias; its
    # contribution = 3x3 conv of the bias-bordered zero image (+ bf).
    p = jnp.pad(jnp.zeros((1, Cout, H, W), f32), ((0, 0), (0, 0), (1, 1), (1, 1)))
    bb = be.astype(f32).reshape(1, Cout, 1, 1)
    p = p.at[:, :, 0:1, :].set(jnp.broadcast_to(bb, (1, Cout, 1, W + 2)))
    p = p.at[:, :, -1:, :].set(jnp.broadcast_to(bb, (1, Cout, 1, W + 2)))
    p = p.at[:, :, :, 0:1].set(jnp.broadcast_to(bb, (1, Cout, H + 2, 1)))
    p = p.at[:, :, :, -1:].set(jnp.broadcast_to(bb, (1, Cout, H + 2, 1)))
    border_nchw = jax.lax.conv_general_dilated(
        p, Wf_oihw.astype(f32), (1, 1), "VALID",
        dimension_numbers=("NCHW", "OIHW", "NCHW"))
    border_nchw = border_nchw + bf.astype(f32).reshape(1, -1, 1, 1)
    border_const = jnp.transpose(border_nchw, (0, 2, 3, 1)).reshape(H, WCout)

    # ---- optional reduced-precision matmul operands --------------------------
    We_block = We_block.astype(matmul_dtype)
    Wcat = Wcat.astype(matmul_dtype)
    Wr_block = Wr_block.astype(matmul_dtype)

    out_packed = pl.pallas_call(
        rrrb_kernel,
        grid=(B,),
        in_specs=[
            pl.BlockSpec((1, H, WCin), lambda b: (b, 0, 0)),
            pl.BlockSpec((WCin, WCout), lambda b: (0, 0)),
            pl.BlockSpec((1, WCout), lambda b: (0, 0)),
            pl.BlockSpec((3 * WCout, WCout), lambda b: (0, 0)),
            pl.BlockSpec((H, WCout), lambda b: (0, 0)),
            pl.BlockSpec((WCout, WCin), lambda b: (0, 0)),
            pl.BlockSpec((1, WCin), lambda b: (0, 0)),
        ],
        out_specs=pl.BlockSpec((1, H, WCin), lambda b: (b, 0, 0)),
        out_shape=jax.ShapeDtypeStruct((B, H, WCin), jnp.float32),
        compiler_params=pltpu.CompilerParams(
            dimension_semantics=("parallel",)),
    )(x_packed, We_block, be_row, Wcat, border_const, Wr_block, br_row)

    return jnp.transpose(out_packed.reshape(B, H, W, Cin), (0, 3, 1, 2))


def rrrb_reference(x, params):
    """Pure-JAX NCHW reference matching the PyTorch forward exactly."""
    We, be, Wf, bf, Wr, br = params

    def conv(t, w, b):
        y = jax.lax.conv_general_dilated(
            t, w, window_strides=(1, 1), padding="VALID",
            dimension_numbers=("NCHW", "OIHW", "NCHW"))
        return y + b.reshape(1, -1, 1, 1)

    out = conv(x, We, be)
    ident = out
    p = jnp.pad(out, ((0, 0), (0, 0), (1, 1), (1, 1)))
    Bn, Cn, Hp, Wp = p.shape
    bb = be.reshape(1, -1, 1, 1)
    p = p.at[:, :, 0:1, :].set(jnp.broadcast_to(bb, (Bn, Cn, 1, Wp)))
    p = p.at[:, :, Hp - 1:Hp, :].set(jnp.broadcast_to(bb, (Bn, Cn, 1, Wp)))
    p = p.at[:, :, :, 0:1].set(jnp.broadcast_to(bb, (Bn, Cn, Hp, 1)))
    p = p.at[:, :, :, Wp - 1:Wp].set(jnp.broadcast_to(bb, (Bn, Cn, Hp, 1)))
    out = conv(p, Wf, bf) + ident
    out = conv(out, Wr, br)
    return out + x


if __name__ == "__main__":
    # RRRB(in_places=4, out_places=8, kernel_size=3, stride=1)
    B, Cin, Cout, H, W = 2, 4, 8, 16, 16

    key = jax.random.PRNGKey(0)
    ks = jax.random.split(key, 7)
    We_oihw = jax.random.normal(ks[0], (Cout, Cin, 1, 1), jnp.float32) * 0.1
    be = jax.random.normal(ks[1], (Cout,), jnp.float32) * 0.1
    Wf_oihw = jax.random.normal(ks[2], (Cout, Cout, 3, 3), jnp.float32) * 0.1
    bf = jax.random.normal(ks[3], (Cout,), jnp.float32) * 0.1
    Wr_oihw = jax.random.normal(ks[4], (Cin, Cout, 1, 1), jnp.float32) * 0.1
    br = jax.random.normal(ks[5], (Cin,), jnp.float32) * 0.1
    x = jax.random.normal(ks[6], (B, Cin, H, W), jnp.float32)

    params = (We_oihw, be, Wf_oihw, bf, Wr_oihw, br)

    out = jax.block_until_ready(rrrb_forward(x, params))
    ref = jax.block_until_ready(rrrb_reference(x, params))
    np.testing.assert_allclose(np.asarray(out), np.asarray(ref),
                               rtol=1e-4, atol=1e-4)
    print("KERNEL_OK")
</pallas_src>

<mosaic_0001>
module attributes {stable_mosaic.version = 11 : i64} {
  func.func @rrrb_kernel(%arg0: i32, %arg1: memref<1x16x64xf32, #tpu.memory_space<vmem>>, %arg2: memref<64x128xf32, #tpu.memory_space<vmem>>, %arg3: memref<1x128xf32, #tpu.memory_space<vmem>>, %arg4: memref<384x128xf32, #tpu.memory_space<vmem>>, %arg5: memref<16x128xf32, #tpu.memory_space<vmem>>, %arg6: memref<128x64xf32, #tpu.memory_space<vmem>>, %arg7: memref<1x64xf32, #tpu.memory_space<vmem>>, %arg8: memref<1x16x64xf32, #tpu.memory_space<vmem>>) attributes {dimension_semantics = [#tpu.dimension_semantics<parallel>], iteration_bounds = array<i64: 2>, scalar_prefetch = 0 : i64, scratch_operands = 0 : i64, tpu.core_type = #tpu.core_type<tc>, window_params = [{transform_indices = @transform_0, window_bounds = array<i64: 1, 16, 64>}, {pipeline_mode = #tpu.pipeline_mode<synchronous>, transform_indices = @transform_1, window_bounds = array<i64: 64, 128>}, {pipeline_mode = #tpu.pipeline_mode<synchronous>, transform_indices = @transform_2, window_bounds = array<i64: 1, 128>}, {pipeline_mode = #tpu.pipeline_mode<synchronous>, transform_indices = @transform_3, window_bounds = array<i64: 384, 128>}, {pipeline_mode = #tpu.pipeline_mode<synchronous>, transform_indices = @transform_4, window_bounds = array<i64: 16, 128>}, {pipeline_mode = #tpu.pipeline_mode<synchronous>, transform_indices = @transform_5, window_bounds = array<i64: 128, 64>}, {pipeline_mode = #tpu.pipeline_mode<synchronous>, transform_indices = @transform_6, window_bounds = array<i64: 1, 64>}, {transform_indices = @transform_7, window_bounds = array<i64: 1, 16, 64>}]} {
    %c0 = arith.constant 0 : index
    %c0_0 = arith.constant 0 : index
    %c0_1 = arith.constant 0 : index
    %0 = vector.load %arg1[%c0, %c0_0, %c0_1] : memref<1x16x64xf32, #tpu.memory_space<vmem>>, vector<1x16x64xf32>
    %1 = vector.shape_cast %0 : vector<1x16x64xf32> to vector<16x64xf32>
    %c0_2 = arith.constant 0 : index
    %c0_3 = arith.constant 0 : index
    %2 = vector.load %arg2[%c0_2, %c0_3] : memref<64x128xf32, #tpu.memory_space<vmem>>, vector<64x128xf32>
    %cst = arith.constant dense<0.000000e+00> : vector<16x128xf32>
    %3 = tpu.matmul %1, %2, %cst {dimension_numbers = #tpu.dot_dimension_numbers<[1], [0], [0], [1], [0, 0, 1, 1], [], []>} : vector<16x64xf32>, vector<64x128xf32>, vector<16x128xf32> -> vector<16x128xf32>
    %c0_4 = arith.constant 0 : index
    %c0_5 = arith.constant 0 : index
    %4 = vector.load %arg3[%c0_4, %c0_5] : memref<1x128xf32, #tpu.memory_space<vmem>>, vector<1x128xf32>
    %5 = vector.broadcast %4 : vector<1x128xf32> to vector<16x128xf32>
    %6 = arith.addf %3, %5 : vector<16x128xf32>
    %7 = tpu.iota {dimensions = array<i32: 0>} : vector<16x128xi32>
    %c0_i32 = arith.constant 0 : i32
    %8 = vector.broadcast %c0_i32 : i32 to vector<16x128xi32>
    %9 = arith.cmpi sgt, %7, %8 : vector<16x128xi32>
    %c1_i32 = arith.constant 1 : i32
    %10 = tpu.dynamic_rotate %6 by %c1_i32 dim 0 : vector<16x128xf32>, i32 -> vector<16x128xf32>
    %cst_6 = arith.constant 0.000000e+00 : f32
    %11 = vector.broadcast %cst_6 : f32 to vector<16x128xf32>
    %12 = arith.select %9, %10, %11 : vector<16x128xi1>, vector<16x128xf32>
    %c15_i32 = arith.constant 15 : i32
    %13 = vector.broadcast %c15_i32 : i32 to vector<16x128xi32>
    %14 = arith.cmpi slt, %7, %13 : vector<16x128xi32>
    %c15_i32_7 = arith.constant 15 : i32
    %15 = tpu.dynamic_rotate %6 by %c15_i32_7 dim 0 : vector<16x128xf32>, i32 -> vector<16x128xf32>
    %cst_8 = arith.constant 0.000000e+00 : f32
    %16 = vector.broadcast %cst_8 : f32 to vector<16x128xf32>
    %17 = arith.select %14, %15, %16 : vector<16x128xi1>, vector<16x128xf32>
    %18 = tpu.concatenate %12, %6, %17 in 1 : vector<16x128xf32>, vector<16x128xf32>, vector<16x128xf32> -> vector<16x384xf32>
    %c0_9 = arith.constant 0 : index
    %c0_10 = arith.constant 0 : index
    %19 = vector.load %arg4[%c0_9, %c0_10] : memref<384x128xf32, #tpu.memory_space<vmem>>, vector<384x128xf32>
    %cst_11 = arith.constant dense<0.000000e+00> : vector<16x128xf32>
    %20 = tpu.matmul %18, %19, %cst_11 {dimension_numbers = #tpu.dot_dimension_numbers<[1], [0], [0], [1], [0, 0, 1, 1], [], []>} : vector<16x384xf32>, vector<384x128xf32>, vector<16x128xf32> -> vector<16x128xf32>
    %c0_12 = arith.constant 0 : index
    %c0_13 = arith.constant 0 : index
    %21 = vector.load %arg5[%c0_12, %c0_13] : memref<16x128xf32, #tpu.memory_space<vmem>>, vector<16x128xf32>
    %22 = arith.addf %20, %21 : vector<16x128xf32>
    %c0_14 = arith.constant 0 : index
    %c0_15 = arith.constant 0 : index
    %23 = vector.load %arg6[%c0_14, %c0_15] : memref<128x64xf32, #tpu.memory_space<vmem>>, vector<128x64xf32>
    %cst_16 = arith.constant dense<0.000000e+00> : vector<16x64xf32>
    %24 = tpu.matmul %22, %23, %cst_16 {dimension_numbers = #tpu.dot_dimension_numbers<[1], [0], [0], [1], [0, 0, 1, 1], [], []>} : vector<16x128xf32>, vector<128x64xf32>, vector<16x64xf32> -> vector<16x64xf32>
    %c0_17 = arith.constant 0 : index
    %c0_18 = arith.constant 0 : index
    %25 = vector.load %arg7[%c0_17, %c0_18] : memref<1x64xf32, #tpu.memory_space<vmem>>, vector<1x64xf32>
    %26 = vector.broadcast %25 : vector<1x64xf32> to vector<16x64xf32>
    %27 = arith.addf %24, %26 : vector<16x64xf32>
    %28 = arith.addf %27, %1 : vector<16x64xf32>
    %c0_19 = arith.constant 0 : index
    %c0_20 = arith.constant 0 : index
    %c0_21 = arith.constant 0 : index
    %29 = vector.load %arg8[%c0_19, %c0_20, %c0_21] : memref<1x16x64xf32, #tpu.memory_space<vmem>>, vector<1x16x64xf32>
    %30 = vector.shape_cast %29 : vector<1x16x64xf32> to vector<16x64xf32>
    %31 = vector.shape_cast %28 : vector<16x64xf32> to vector<1x16x64xf32>
    tpu.vector_store %arg8[%c0_19, %c0_20, %c0_21], %31 {strides = array<i32>} : memref<1x16x64xf32, #tpu.memory_space<vmem>>, vector<1x16x64xf32>,
    return
  }
  func.func @transform_0(%arg0: i32) -> (i32, i32, i32) {
    %c0_i32 = arith.constant 0 : i32
    %c0_i32_0 = arith.constant 0 : i32
    %c0_i32_1 = arith.constant 0 : i32
    return %arg0, %c0_i32, %c0_i32_0 : i32, i32, i32
  }
  func.func @transform_1(%arg0: i32) -> (i32, i32) {
    %c0_i32 = arith.constant 0 : i32
    %c0_i32_0 = arith.constant 0 : i32
    %c0_i32_1 = arith.constant 0 : i32
    return %c0_i32, %c0_i32_0 : i32, i32
  }
  func.func @transform_2(%arg0: i32) -> (i32, i32) {
    %c0_i32 = arith.constant 0 : i32
    %c0_i32_0 = arith.constant 0 : i32
    %c0_i32_1 = arith.constant 0 : i32
    return %c0_i32, %c0_i32_0 : i32, i32
  }
  func.func @transform_3(%arg0: i32) -> (i32, i32) {
    %c0_i32 = arith.constant 0 : i32
    %c0_i32_0 = arith.constant 0 : i32
    %c0_i32_1 = arith.constant 0 : i32
    return %c0_i32, %c0_i32_0 : i32, i32
  }
  func.func @transform_4(%arg0: i32) -> (i32, i32) {
    %c0_i32 = arith.constant 0 : i32
    %c0_i32_0 = arith.constant 0 : i32
    %c0_i32_1 = arith.constant 0 : i32
    return %c0_i32, %c0_i32_0 : i32, i32
  }
  func.func @transform_5(%arg0: i32) -> (i32, i32) {
    %c0_i32 = arith.constant 0 : i32
    %c0_i32_0 = arith.constant 0 : i32
    %c0_i32_1 = arith.constant 0 : i32
    return %c0_i32, %c0_i32_0 : i32, i32
  }
  func.func @transform_6(%arg0: i32) -> (i32, i32) {
    %c0_i32 = arith.constant 0 : i32
    %c0_i32_0 = arith.constant 0 : i32
    %c0_i32_1 = arith.constant 0 : i32
    return %c0_i32, %c0_i32_0 : i32, i32
  }
  func.func @transform_7(%arg0: i32) -> (i32, i32, i32) {
    %c0_i32 = arith.constant 0 : i32
    %c0_i32_0 = arith.constant 0 : i32
    %c0_i32_1 = arith.constant 0 : i32
    return %arg0, %c0_i32, %c0_i32_0 : i32, i32, i32
  }
}

</mosaic_0001>

<bundles_post_ra>
// kernel: tpu_custom_call.1
= control target key start
LH: loop header
LB: loop body
LE: loop exit
PB: predicated region body
PF: predicated region fallthrough
CT: control target
= control target key end

     0   :  { %12 = vsyncpa [#allocation3], 0  ;;  %s1543_s0 = inlined_call_operand.vmem [shape: f32[2,16,64], index: 0, kind: input, shape index: {}]   ;;  %s1544_s1 = inlined_call_operand.vmem [shape: f32[64,128], index: 1, kind: input, shape index: {}]   ;;  %s1545_s2 = inlined_call_operand.vmem [shape: f32[1,128], index: 2, kind: input, shape index: {}]   ;;  %s1546_s3 = inlined_call_operand.hbm [shape: f32[384,128], index: 3, kind: input, shape index: {}]   ;;  %s1547_s4 = inlined_call_operand.vmem [shape: f32[16,128], index: 4, kind: input, shape index: {}]   ;;  %s1548_s5 = inlined_call_operand.vmem [shape: f32[128,64], index: 5, kind: input, shape index: {}]   ;;  %s1549_s6 = inlined_call_operand.vmem [shape: f32[1,64], index: 6, kind: input, shape index: {}]   ;;  %s1550_s7 = inlined_call_operand.hbm [shape: f32[2,16,64], index: 7, kind: output, shape index: {}]  }
   0x1   :  { %13 = vsyncpa [#allocation4], 0 }
   0x2   :  { %15 = vsyncpa [#allocation4 + $0x1], 0  ;;  %s1305_s24 = smov 0   ;;  %s1307_s25 = smov 0  }
   0x3   :  { %s1309_s26 = smov 0   ;;  %s1311_s27 = smov 0  }
   0x4 LB: > { %s1326_s28 = sadd.s32 4294967295, %s1257_s27   ;;  %s802_s29 = sadd.s32 4294967294, %s1257_s27   ;;  %s1257_s27 = sphi %s1311_s27, %s1566_s27   ;;  %s1253_s26 = sphi %s1309_s26, %s1565_s26   ;;  %s1249_s25 = sphi %s1307_s25, %s1564_s25   ;;  %s1245_s24 = sphi %s1305_s24, %s1563_s24  }
   0x5   : > { %s1330_s30 = sadd.s32 1, %s1257_s27   ;;  %s180_s8 = sadd.s32 1, %s1253_s26 }
   0x6   : > { %s177_s9 = ssub.s32 %s1257_s27, %s1330_s30  ;;  %p190_p0 = scmp.ne.s32.totalorder %s1253_s26, %s1249_s25 }
   0x7   : > { %p178_p1 = scmp.eq.s32.totalorder %s177_s9, 0  ;;  %p191_p2 = scmp.eq.s32.totalorder %s1326_s28, 1 }
   0x8   : > { %p196_p3 = scmp.ne.s32.totalorder %s1249_s25, %s1245_s24  ;;  %p197_p4 = scmp.eq.s32.totalorder %s802_s29, 1 }
   0x9   : > { %s1341_s10 = scalar_select %p178_p1, %s1253_s26, %s180_s8  }
   0xa   : > { %p1343_p5 = por %p191_p2, %p190_p0  ;;  %p1347_p6 = por %p197_p4, %p196_p3 }
   0xb   : > { %p803_p7 = scmp.ge.s32.totalorder %s1257_s27, 1  ;;  %p204_p8 = scmp.lt.s32.totalorder %s1257_s27, 3 }
   0xc   : > { %s1554_s11 = scalar_select %p1343_p5, 1, 0 }
   0xd   : > { %s1555_s12 = scalar_select %p1347_p6, 1, 0 }
   0xe   : > { %p1551_p9 = scmp.eq.s32.totalorder %s1326_s28, 0  ;;  %p1354_p10 = pnand %p803_p7, %p204_p8 }
   0xf   : > { %s1259_s14 = smov [#allocation2]   ;;  %s1163_s19 = scalar_lea.hbm %s1546_s3, 6144 }
  0x10   : > { %s1556_s13 = scalar_select %p1354_p10, 1, 0 }
  0x11   : > { %s222_s15 = sshll.u32 %s1259_s14, 4  ;;  %p1115_p11 = pneg %p1354_p10  ;;  %s223_s15 = int_to_ptr.vmem [resolvable:$true] %s222_s15 }
  0x12   : > { %p1164_p13 = scmp.ne.s32.totalorder %s1546_s3, %s1163_s19  ;;  %p1170_p3 = scmp.lt.u32.totalorder %s1163_s19, %s1546_s3 }
  0x13   : > { %p1362_p12 = pnand %p1551_p9, %p1115_p11 }
  0x15   : > { %p1165_p0 = pneg %p1362_p12 }
  0x17   : > { %p1166_p1 = pnand %p1165_p0, %p1164_p13 }
  0x19   : > { %p1167_p2 = pneg %p1166_p1 }
  0x1b   : > { %p1172_p4 = pnand %p1170_p3, %p1167_p2 }
  0x1d   : > { %1175 = shalt.err (!%p1172_p4)
}
  0x1e   : > { %s1176_s29 = scalar_lea.vmem %s223_s15, 6144  ;;  %p1184_p9 = scmp.lt.s32.totalorder %s223_s15, %s223_s15 }
  0x1f   : > { %p1177_p7 = scmp.ne.s32.totalorder %s223_s15, %s1176_s29  ;;  %p1185_p6 = scmp.lt.s32.totalorder %s1176_s29, %s1176_s29 }
  0x21   : > { %p1179_p8 = pnand %p1177_p7, %p1165_p0  ;;  %p1186_p5 = por %p1185_p6, %p1184_p9 }
  0x23   : > { %p1180_p11 = pneg %p1179_p8 }
  0x25   : > { %p1187_p10 = pnand %p1186_p5, %p1180_p11 }
  0x27   : > { %1190 = shalt.err (!%p1187_p10)
}
  0x28   : > { %s1260_s8 = smov 128   ;;  %s1261_s9 = smov 8  }
  0x29   : > { %1118 = dma.hbm_to_vmem [thread:$0]  (!%p1362_p12), %s1546_s3, 6144, %s223_s15, [#allocation3], %s1260_s8, %s1260_s8, %s1261_s9  }
  0x2a   : > { %p1558_p13 = scmp.ne.s32.totalorder %s1556_s13, 0 }
  0x2b   : > { %p1559_p1 = scmp.eq.s32.totalorder (!%p1558_p13), %s1326_s28, 0 }
  0x2c   : > { %255 = sbr.rel (%p1558_p13) target bundleno = 744 (0x2e8), region = 48 }
  0x33   : > { %1236 = dma.done.wait (%p1559_p1), [#allocation3], 6144   ;;  %p1560_p0 = pmov %p1559_p1 }
  0x34   : > { %p287_p5 = scmp.lt.s32.totalorder %s1326_s28, 1  ;;  %v294_v0 = vld [vmem:[%s1544_s1] sm:$0xff]  ;;  %v295_v1 = vld [vmem:[%s1544_s1 + $0x8] sm:$0xff]  ;;  %v296_v2 = vld [vmem:[%s1544_s1 + $0x10] sm:$0xff]  ;;  %vm309_vm0 = vcmask 523264   ;;  %s284_s16 = sand.u32 1, %s1249_s25  }
  0x35   : > { %1238 = vsyncadd (%p1560_p0), [#allocation3], 4294961152  ;;  %v997_v3 = vpack.c.bf16 %v295_v1, %v294_v0  ;;  %v297_v4 = vld [vmem:[%s1544_s1 + $0x18] sm:$0xff]  ;;  %v298_v6 = vld [vmem:[%s1544_s1 + $0x20] sm:$0xff]  ;;  %s808_s15 = sshll.u32 %s284_s16, 4  ;;  %p1561_p9 = scmp.ne.s32.totalorder %s1554_s11, 0 }
  0x36   : > { %s288_s18 = scalar_select %p287_p5, %s1326_s28, 1  ;;  %v1001_v5 = vpack.c.bf16 %v297_v4, %v296_v2  ;;  %v299_v7 = vld [vmem:[%s1544_s1 + $0x28] sm:$0xff]  ;;  %v428_v9 = vld [vmem:[#allocation2 + $0x80] sm:$0xff]  ;;  %v300_v15 = vld [vmem:[%s1544_s1 + $0x30] sm:$0xff] }
  0x37   : > { %998 = vmatprep.subr.bf16.mxu0 %v997_v3  ;;  %v429_v10 = vld [vmem:[#allocation2 + $0x88] sm:$0xff]  ;;  %v412_v12 = vld [vmem:[#allocation2] sm:$0xff]  ;;  %v1005_v14 = vpack.c.bf16 %v299_v7, %v298_v6  ;;  %v430_v17 = vld [vmem:[#allocation2 + $0x90] sm:$0xff]  ;;  %s286_s23 = scalar_lea.vmem [#allocation5], %s808_s15 }
  0x38   : > { %s822_s19 = sshll.u32 %s288_s18, 4  ;;  %1000 = vmatpush3.bf16.msra.mxu0 %v997_v3  ;;  %v1013_v11 = vpack.c.bf16 %v429_v10, %v428_v9  ;;  %v413_v13 = vld [vmem:[#allocation2 + $0x8] sm:$0xff]  ;;  %v431_v18 = vld [vmem:[#allocation2 + $0x98] sm:$0xff]  ;;  %v414_v21 = vld [vmem:[#allocation2 + $0x10] sm:$0xff]  ;;  %s728_s29 = sshll.u32 %s286_s23, 4  ;;  %s1497_s29 = int_to_ptr.vmem [resolvable:$true] %s728_s29 }
  0x39   : > { %s1393_s21 = scalar_lea.vmem %s1543_s0, %s822_s19  ;;  %1002 = vmatprep.subr.bf16.mxu0 %v1001_v5  ;;  %v1015_v16 = vpack.c.bf16 %v413_v13, %v412_v12  ;;  %v301_v19 = vld [vmem:[%s1544_s1 + $0x38] sm:$0xff]  ;;  %v1017_v20 = vpack.c.bf16 %v431_v18, %v430_v17  ;;  %v432_v24 = vld [vmem:[#allocation2 + $0xa0] sm:$0xff]  ;;  %v433_v25 = vld [vmem:[#allocation2 + $0xa8] sm:$0xff]  ;;  %s1191_s17 = scalar_lea.vmem %s1497_s29, 256 }
  0x3a   : > { %v1414_v8 = vld [vmem:[%s1393_s21] sm:$0xff]  ;;  %1014 = vmatprep.subr.bf16.mxu1 %v1013_v11  ;;  %v415_v22 = vld [vmem:[#allocation2 + $0x18] sm:$0xff]  ;;  %v1021_v26 = vpack.c.bf16 %v433_v25, %v432_v24  ;;  %v417_v28 = vld [vmem:[#allocation2 + $0x28] sm:$0xff]  ;;  %v1009_v29 = vpack.c.bf16 %v301_v19, %v300_v15  ;;  %p1192_p6 = scmp.ne.s32.totalorder %s1497_s29, %s1191_s17  ;;  %s1262_s18 = smov [#allocation5]  }
  0x3b   : > { %924 = vmatprep.mubr.msk.f32.mxu0 %vm309_vm0, %v1414_v8  ;;  %1016 = vmatpush3.bf16.msra.mxu1 %v1015_v16  ;;  %v1019_v23 = vpack.c.bf16 %v415_v22, %v414_v21  ;;  %v416_v27 = vld [vmem:[#allocation2 + $0x20] sm:$0xff]  ;;  %v434_v30 = vld [vmem:[#allocation2 + $0xb0] sm:$0xff]  ;;  %v435_v31 = vld [vmem:[#allocation2 + $0xb8] sm:$0xff]  ;;  %s1195_s19 = sshll.u32 %s1262_s18, 4  ;;  %s1196_s19 = int_to_ptr.vmem [resolvable:$false] %s1195_s19 }
  0x3c   : > { %1004 = vmatpush3.bf16.msra.mxu0 %v1001_v5  ;;  %1018 = vmatprep.subr.bf16.mxu1 %v1017_v20  ;;  %v444_v32 = vld [vmem:[#allocation2 + $0x100] sm:$0xff]  ;;  %v445_v33 = vld [vmem:[#allocation2 + $0x108] sm:$0xff]  ;;  %v1023_v34 = vpack.c.bf16 %v417_v28, %v416_v27  ;;  %v1025_v35 = vpack.c.bf16 %v435_v31, %v434_v30  ;;  %v418_v36 = vld [vmem:[#allocation2 + $0x30] sm:$0xff]  ;;  %p1193_p10 = pnand %p1192_p6, %p1561_p9  ;;  %s1197_s20 = scalar_lea.vmem %s1196_s19, 512 }
  0x3d   : > { %1006 = vmatprep.subr.bf16.mxu0 %v1005_v14  ;;  %v419_v37 = vld [vmem:[#allocation2 + $0x38] sm:$0xff]  ;;  %v1045_v38 = vpack.c.bf16 %v445_v33, %v444_v32  ;;  %v436_v39 = vld [vmem:[#allocation2 + $0xc0] sm:$0xff]  ;;  %v437_v40 = vld [vmem:[#allocation2 + $0xc8] sm:$0xff]  ;;  %p1198_p2 = scmp.lt.s32.totalorder %s1497_s29, %s1196_s19  ;;  %p1199_p3 = scmp.lt.s32.totalorder %s1197_s20, %s1191_s17 }
  0x3e   : > { %v446_v41 = vld [vmem:[#allocation2 + $0x110] sm:$0xff]  ;;  %v447_v42 = vld [vmem:[#allocation2 + $0x118] sm:$0xff]  ;;  %v1027_v43 = vpack.c.bf16 %v419_v37, %v418_v36  ;;  %v1425_v44 = vld [vmem:[%s1393_s21 + $0x8] sm:$0xff]  ;;  %v1029_v45 = vpack.c.bf16 %v437_v40, %v436_v39  ;;  %s823_s21 = sshll.u32 %s1326_s28, 8  ;;  %s1502_s28 = scalar_lea.sflag [#allocation4], %s284_s16 }
  0x3f   : > { %1020 = vmatpush3.bf16.msra.mxu1 %v1019_v23  ;;  %v420_v46 = vld [vmem:[#allocation2 + $0x40] sm:$0xff]  ;;  %v421_v47 = vld [vmem:[#allocation2 + $0x48] sm:$0xff]  ;;  %v1049_v48 = vpack.c.bf16 %v447_v42, %v446_v41  ;;  %v438_v49 = vld [vmem:[#allocation2 + $0xd0] sm:$0xff]  ;;  %s1495_s14 = scalar_lea.hbm %s1550_s7, %s823_s21  ;;  %p1194_p12 = pneg %p1193_p10 }
  0x40   : > { %1008 = vmatpush3.bf16.msra.mxu0 %v1005_v14  ;;  %1022 = vmatprep.subr.bf16.mxu1 %v1021_v26  ;;  %v439_v50 = vld [vmem:[#allocation2 + $0xd8] sm:$0xff]  ;;  %v448_v51 = vld [vmem:[#allocation2 + $0x120] sm:$0xff]  ;;  %v449_v52 = vld [vmem:[#allocation2 + $0x128] sm:$0xff]  ;;  %v1031_v53 = vpack.c.bf16 %v421_v47, %v420_v46  ;;  %v391_v26 = vlaneseq  ;;  %p1200_p4 = por %p1199_p3, %p1198_p2 }
  0x41   : > { %1010 = vmatprep.subr.bf16.mxu0 %v1009_v29  ;;  %v1033_v54 = vpack.c.bf16 %v439_v50, %v438_v49  ;;  %v422_v55 = vld [vmem:[#allocation2 + $0x50] sm:$0xff]  ;;  %v423_v56 = vld [vmem:[#allocation2 + $0x58] sm:$0xff]  ;;  %v1053_v57 = vpack.c.bf16 %v449_v52, %v448_v51  ;;  %v440_v58 = vld [vmem:[#allocation2 + $0xe0] sm:$0xff] }
  0x42   : > { %v441_v59 = vld [vmem:[#allocation2 + $0xe8] sm:$0xff]  ;;  %v450_v60 = vld [vmem:[#allocation2 + $0x130] sm:$0xff]  ;;  %v451_v61 = vld [vmem:[#allocation2 + $0x138] sm:$0xff]  ;;  %v1035_v62 = vpack.c.bf16 %v423_v56, %v422_v55  ;;  %v392_v27 = vshrl.u32 %v391_v26, 7  ;;  %p1201_p7 = pnand %p1200_p4, %p1194_p12 }
  0x43   : > { %1024 = vmatpush3.bf16.msra.mxu1 %v1023_v34  ;;  %v1037_v63 = vpack.c.bf16 %v441_v59, %v440_v58  ;;  %v1057_v0 = vpack.c.bf16 %v451_v61, %v450_v60  ;;  %v452_v1 = vld [vmem:[#allocation2 + $0x140] sm:$0xff]  ;;  %v453_v2 = vld [vmem:[#allocation2 + $0x148] sm:$0xff]  ;;  %v454_v4 = vld [vmem:[#allocation2 + $0x150] sm:$0xff] }
  0x44   : > { %1012 = vmatpush3.bf16.msra.mxu0 %v1009_v29  ;;  %1026 = vmatprep.subr.bf16.mxu1 %v1025_v35  ;;  %v1061_v3 = vpack.c.bf16 %v453_v2, %v452_v1  ;;  %v455_v5 = vld [vmem:[#allocation2 + $0x158] sm:$0xff]  ;;  %v424_v7 = vld [vmem:[#allocation2 + $0x60] sm:$0xff]  ;;  %v425_v9 = vld [vmem:[#allocation2 + $0x68] sm:$0xff]  ;;  %v393_v32 = vadd.s32 8, %v392_v27  ;;  %vm398_vm1 = vcmp.lt.s32.totalorder %v392_v27, 1  ;;  %vm407_vm2 = vcmp.lt.s32.totalorder %v392_v27, 7 }
  0x45   : > { %1046 = vmatprep.subr.bf16.mxu0 %v1045_v38  ;;  %v1065_v6 = vpack.c.bf16 %v455_v5, %v454_v4  ;;  %v456_v10 = vld [vmem:[#allocation2 + $0x160] sm:$0xff]  ;;  %v1039_v11 = vpack.c.bf16 %v425_v9, %v424_v7  ;;  %v457_v12 = vld [vmem:[#allocation2 + $0x168] sm:$0xff]  ;;  %v442_v14 = vld [vmem:[#allocation2 + $0xf0] sm:$0xff]  ;;  %vm394_vm3 = vcmp.gt.s32.totalorder %v392_v27, 0 }
  0x46   : > { %v1069_v13 = vpack.c.bf16 %v457_v12, %v456_v10  ;;  %v443_v15 = vld [vmem:[#allocation2 + $0xf8] sm:$0xff]  ;;  %v426_v17 = vld [vmem:[#allocation2 + $0x70] sm:$0xff]  ;;  %v612_v23 = vld [vmem:[%s1548_s5] sm:$0xff]  ;;  %vm404_vm4 = vcmp.lt.s32.totalorder %v393_v32, 15 }
  0x47   : > { %925 = vmatmul.mubr.msk.f32.vlgmr.msra.gmra.mrb[0].mxu0 %vm309_vm0, %v1425_v44  ;;  %1028 = vmatpush3.bf16.msra.mxu1 %v1027_v43  ;;  %v1041_v16 = vpack.c.bf16 %v443_v15, %v442_v14  ;;  %v427_v18 = vld [vmem:[#allocation2 + $0x78] sm:$0xff]  ;;  %v458_v19 = vld [vmem:[#allocation2 + $0x170] sm:$0xff]  ;;  %v613_v24 = vld [vmem:[%s1548_s5 + $0x8] sm:$0xff] }
  0x48   : > { %1048 = vmatpush3.bf16.msra.mxu0 %v1045_v38  ;;  %1030 = vmatprep.subr.bf16.mxu1 %v1029_v45  ;;  %v1043_v20 = vpack.c.bf16 %v427_v18, %v426_v17  ;;  %v459_v21 = vld [vmem:[#allocation2 + $0x178] sm:$0xff]  ;;  %v1077_v25 = vpack.c.bf16 %v613_v24, %v612_v23  ;;  %v811_v28 = vld [vmem:[%s1545_s2] ss:$0 sm:$0xff]  ;;  %v614_v34 = vld [vmem:[%s1548_s5 + $0x10] sm:$0xff] }
  0x49   : > { %1050 = vmatprep.subr.bf16.mxu0 %v1049_v48  ;;  %v1073_v22 = vpack.c.bf16 %v459_v21, %v458_v19  ;;  %v615_v35 = vld [vmem:[%s1548_s5 + $0x18] sm:$0xff]  ;;  %v616_v46 = vld [vmem:[%s1548_s5 + $0x20] sm:$0xff]  ;;  %v617_v47 = vld [vmem:[%s1548_s5 + $0x28] sm:$0xff] }
  0x4a   : > { %v1081_v40 = vpack.c.bf16 %v615_v35, %v614_v34  ;;  %v618_v49 = vld [vmem:[%s1548_s5 + $0x30] sm:$0xff]  ;;  %v619_v50 = vld [vmem:[%s1548_s5 + $0x38] sm:$0xff]  ;;  %v620_v52 = vld [vmem:[%s1548_s5 + $0x40] sm:$0xff] }
  0x4b   : > { %1032 = vmatpush3.bf16.msra.mxu1 %v1031_v53  ;;  %v1089_v51 = vpack.c.bf16 %v619_v50, %v618_v49  ;;  %v621_v53 = vld [vmem:[%s1548_s5 + $0x48] sm:$0xff]  ;;  %v622_v55 = vld [vmem:[%s1548_s5 + $0x50] sm:$0xff]  ;;  %v623_v56 = vld [vmem:[%s1548_s5 + $0x58] sm:$0xff] }
  0x4c   : > { %1052 = vmatpush3.bf16.msra.mxu0 %v1049_v48  ;;  %1034 = vmatprep.subr.bf16.mxu1 %v1033_v54  ;;  %v1085_v48 = vpack.c.bf16 %v617_v47, %v616_v46  ;;  %v1093_v54 = vpack.c.bf16 %v621_v53, %v620_v52  ;;  %v624_v58 = vld [vmem:[%s1548_s5 + $0x60] sm:$0xff]  ;;  %v625_v59 = vld [vmem:[%s1548_s5 + $0x68] sm:$0xff]  ;;  %v626_v61 = vld [vmem:[%s1548_s5 + $0x70] sm:$0xff] }
  0x4d   : > { %1054 = vmatprep.subr.bf16.mxu0 %v1053_v57  ;;  %v1101_v60 = vpack.c.bf16 %v625_v59, %v624_v58  ;;  %v461_v9 = vld [vmem:[%s1547_s4 + $0x8] sm:$0xff]  ;;  %v816_v15 = vld [vmem:[%s1549_s6] ss:$0 sm:$0xff] }
  0x4f   : > { %1036 = vmatpush3.bf16.msra.mxu1 %v1035_v62  ;;  %v627_v62 = vld [vmem:[%s1548_s5 + $0x78] sm:$0xff] }
  0x50   : > { %1056 = vmatpush3.bf16.msra.mxu0 %v1053_v57  ;;  %1038 = vmatprep.subr.bf16.mxu1 %v1037_v63  ;;  %v1097_v57 = vpack.c.bf16 %v623_v56, %v622_v55  ;;  %v1105_v63 = vpack.c.bf16 %v627_v62, %v626_v61 }
  0x51   : > { %1058 = vmatprep.subr.bf16.mxu0 %v1057_v0 }
  0x53   : > { %1040 = vmatpush3.bf16.msra.mxu1 %v1039_v11 }
  0x54   : > { %1060 = vmatpush3.bf16.msra.mxu0 %v1057_v0  ;;  %1042 = vmatprep.subr.bf16.mxu1 %v1041_v16 }
  0x55   : > { %1062 = vmatprep.subr.bf16.mxu0 %v1061_v3 }
  0x57   : > { %1044 = vmatpush3.bf16.msra.mxu1 %v1043_v20 }
  0x58   : > { %1064 = vmatpush3.bf16.msra.mxu0 %v1061_v3  ;;  %1078 = vmatprep.subr.bf16.mxu1 %v1077_v25  ;;  %v460_v3 = vld [vmem:[%s1547_s4] sm:$0xff] }
  0x59   : > { %1066 = vmatprep.subr.bf16.mxu0 %v1065_v6 }
  0x5c   : > { %1068 = vmatpush3.bf16.msra.mxu0 %v1065_v6 }
  0x5d   : > { %1070 = vmatprep.subr.bf16.mxu0 %v1069_v13 }
  0x60   : > { %1072 = vmatpush3.bf16.msra.mxu0 %v1069_v13 }
  0x61   : > { %1074 = vmatprep.subr.bf16.mxu0 %v1073_v22 }
  0x64   : > { %1076 = vmatpush3.bf16.msra.mxu0 %v1073_v22 }
 0x11a   : > { %v926_v29 = vpop.f32.mrb[0].mxu0 }
 0x11b   : > { %v388_v30 = vadd.f32 %v926_v29, %v811_v28  ;;  %v382_v31 = vpop.f32.mrb[1].mxu0 }
 0x11c   : > { %v383_v33 = vadd.f32 %v811_v28, %v382_v31 }
 0x11d   : > { %v397_v36 = vrot.slane %v388_v30, 7  ;;  %v406_v37 = vrot.slane %v388_v30, 1 }
 0x11e   : > { %v396_v38 = vrot.slane %v383_v33, 7  ;;  %v405_v39 = vrot.slane %v383_v33, 1  ;;  %526 = vmatprep.mubr.f32.mxu1 %v383_v33 }
 0x120   : > { %v400_v41 = vsel %vm398_vm1, %v397_v36, %v396_v38  ;;  %v408_v42 = vsel %vm407_vm2, %v405_v39, %v406_v37  ;;  %v409_v43 = vsel %vm407_vm2, %v406_v37, %v405_v39  ;;  %v399_v45 = vsel %vm398_vm1, %v396_v38, %v397_v36 }
 0x121   : > { %814 = vmatmul.mubr.msk.f32.vlgmr.msra.gmra.mrb[0].mxu1 %vm394_vm3, %v400_v41  ;;  %959 = vmatprep.mubr.f32.mxu0 %v408_v42 }
 0x122   : > { %531 = vmatprep.mubr.f32.mxu1 %v388_v30  ;;  %960 = vmatmul.mubr.msk.f32.vlgmr.msra.gmra.mrb[2].mxu0 %vm404_vm4, %v409_v43 }
 0x123   : > { %1080 = vmatpush3.bf16.msra.mxu1 %v1077_v25 }
 0x124   : > { %1082 = vmatprep.subr.bf16.mxu1 %v1081_v40 }
 0x125   : > { %532 = vmatmul.mubr.f32.gmra.mrb[2].mxu1 %v399_v45 }
 0x127   : > { %1084 = vmatpush3.bf16.msra.mxu1 %v1081_v40 }
 0x128   : > { %1086 = vmatprep.subr.bf16.mxu1 %v1085_v48 }
 0x12b   : > { %1088 = vmatpush3.bf16.msra.mxu1 %v1085_v48 }
 0x12c   : > { %1090 = vmatprep.subr.bf16.mxu1 %v1089_v51 }
 0x12f   : > { %1092 = vmatpush3.bf16.msra.mxu1 %v1089_v51 }
 0x130   : > { %1094 = vmatprep.subr.bf16.mxu1 %v1093_v54 }
 0x133   : > { %1096 = vmatpush3.bf16.msra.mxu1 %v1093_v54 }
 0x134   : > { %1098 = vmatprep.subr.bf16.mxu1 %v1097_v57 }
 0x137   : > { %1100 = vmatpush3.bf16.msra.mxu1 %v1097_v57 }
 0x138   : > { %1102 = vmatprep.subr.bf16.mxu1 %v1101_v60 }
 0x13b   : > { %1104 = vmatpush3.bf16.msra.mxu1 %v1101_v60 }
 0x13c   : > { %1106 = vmatprep.subr.bf16.mxu1 %v1105_v63 }
 0x13f   : > { %1108 = vmatpush3.bf16.msra.mxu1 %v1105_v63 }
 0x1f4   : > { %v866_v0 = vpop.f32.mrb[0].mxu1 }
 0x1f5   : > { %v867_v1 = vpop.f32.mrb[1].mxu1  ;;  %v961_v2 = vpop.f32.mrb[2].mxu0 }
 0x1f6   : > { %v868_v4 = vadd.f32 %v867_v1, %v866_v0  ;;  %v603_v5 = vpop.f32.mrb[3].mxu0 }
 0x1f8   : > { %v529_v6 = vadd.f32 %v868_v4, %v460_v3  ;;  %v869_v7 = vpop.f32.mrb[2].mxu1 }
 0x1f9   : > { %v870_v10 = vpop.f32.mrb[3].mxu1 }
 0x1fa   : > { %v604_v11 = vadd.f32 %v603_v5, %v529_v6  ;;  %v871_v12 = vadd.f32 %v870_v10, %v869_v7 }
 0x1fc   : > { %v534_v13 = vadd.f32 %v871_v12, %v461_v9  ;;  %994 = vmatprep.mubr.f32.mxu1 %v604_v11 }
 0x1fe   : > { %v609_v14 = vadd.f32 %v961_v2, %v534_v13 }
 0x200   : > { %995 = vmatmul.mubr.f32.vlgmr.msra.gmra.mrb[4].mxu1 %v609_v14 }
 0x2d3   : > { %v996_v16 = vpop.f32.mrb[4].mxu1 }
 0x2d4   : > { %v707_v17 = vadd.f32 %v996_v16, %v816_v15  ;;  %v701_v18 = vpop.f32.mrb[5].mxu1 }
 0x2d5   : > { %v702_v19 = vadd.f32 %v816_v15, %v701_v18 }
 0x2d6   : > { %v711_v20 = vadd.f32 %v707_v17, %v1425_v44 }
 0x2d7   : > { %v710_v21 = vadd.f32 %v702_v19, %v1414_v8 }
 0x2d8   : > { %713 = vst.msk [vmem:[%s286_s23 + $0x8] sm:$0xff] %vm309_vm0, %v711_v20 }
 0x2d9   : > { %712 = vst.msk [vmem:[%s286_s23] sm:$0xff] %vm309_vm0, %v710_v21 }
 0x2da   : > { %1204 = shalt.err (!%p1201_p7)
}
 0x2db   : > { %s1205_s16 = scalar_lea.hbm %s1495_s14, 256  ;;  %s1209_s13 = scalar_lea.hbm %s1550_s7, 512 }
 0x2dc   : > { %p1206_p8 = scmp.ne.s32.totalorder %s1495_s14, %s1205_s16  ;;  %p1210_p1 = scmp.lt.u32.totalorder %s1495_s14, %s1550_s7 }
 0x2dd   : > { %p1211_p0 = scmp.lt.u32.totalorder %s1209_s13, %s1205_s16  ;;  %p1213_p6 = scmp.lt.u32.totalorder %s1205_s16, %s1495_s14 }
 0x2de   : > { %p1207_p11 = pnand %p1206_p8, %p1561_p9 }
 0x2df   : > { %p1212_p5 = por %p1211_p0, %p1210_p1 }
 0x2e0   : > { %p1208_p13 = pneg %p1207_p11 }
 0x2e1   : > { %p1214_p10 = por %p1213_p6, %p1212_p5 }
 0x2e3   : > { %p1215_p12 = pnand %p1214_p10, %p1208_p13 }
 0x2e5   : > { %1218 = shalt.err (!%p1215_p12)
}
 0x2e6   : > { %s1263_s8 = smov 128   ;;  %s1264_s9 = smov 8  }
 0x2e7   : > { %1113 = dma.vmem_to_hbm [thread:$0]  (%p1561_p9), %s1497_s29, 256, %s1495_s14, %s1502_s28, %s1263_s8, %s1263_s8, %s1264_s9  }
 0x2e8 PF: > { %p1125_p2 = scmp.ge.s32.totalorder %s1257_s27, 2  ;;  %s743_s17 = sand.u32 1, %s1245_s24  }
 0x2e9   : > { %p1562_p3 = scmp.ne.s32.totalorder %s1555_s12, 0  ;;  %s744_s18 = scalar_lea.sflag [#allocation4], %s743_s17 }
 0x2eb   : > { %p1120_p4 = pnand %p1125_p2, %p1562_p3 }
 0x2ed   : > { %1240 = dma.done.wait (!%p1120_p4), %s744_s18, 256  }
 0x2ee   : > { %1242 = vsyncadd (!%p1120_p4), %s744_s18, 4294967040  ;;  %p18_p7 = scmp.ge.s32.totalorder %s1330_s30, 4   ;;  %s1563_s24 = smov %s1249_s25 }
 0x2ef   : > { %s1564_s25 = smov %s1253_s26  ;;  %s1565_s26 = smov %s1341_s10 }
 0x2f0   : > { %s1566_s27 = smov %s1330_s30  ;;  %20 = sbr.rel (!%p18_p7) target bundleno = 4 (0x4), region = 88 }
 0x2f7   :  { %749 = vsyncpa [#allocation3], 1 }
 0x2f8   :  { %751 = vsyncpa [#allocation3 + $0x1], 1 }
 0x2f9   :  { %752 = vsyncpa [#allocation4], 1 }
 0x2fa   :  { %754 = vsyncpa [#allocation4 + $0x1], 1 }

</bundles_post_ra>
